<compile_context>
chip_gen: v6e
topology: v6e:2x2x1
jax: 0.10.0
libtpu: 0.0.40
codegen_flags: <defaults>
</compile_context>

<pallas_src>
import functools
import re

import jax
import jax.numpy as jnp
from jax import lax
from jax.experimental import pallas as pl
from jax.experimental.pallas import tpu as pltpu

_LANES = 128
_CHUNK_UNROLL_THRESHOLD = 32  # static unroll below, lax.fori_loop(unroll=8) above


def _cross_entropy_tile_kernel(logits_ref, target_ref, out_ref, *,
                               n_valid, tile_rows, max_in_native):
    """One batch tile: partial_sum_b [ logsumexp(x_b) - x_b[target_b] ] over valid rows."""
    i = pl.program_id(0)
    tb, c = logits_ref.shape
    tgt = target_ref[...]                                   # [TB, 1] int32

    if c % _LANES == 0 and c > _LANES:
        # Fold the class axis into 128-lane VPU partials; a single cross-lane (XLU)
        # reduce per quantity at the end keeps the EUP exp stream busy.
        n_chunks = c // _LANES
        lane = jax.lax.broadcasted_iota(jnp.int32, (tb, _LANES), 1)

        def load_chunk(k, dynamic):
            start = k * _LANES
            if dynamic:
                start = pl.multiple_of(start, _LANES)
            return logits_ref[:, pl.ds(start, _LANES)]      # slice the Ref, not a value

        if max_in_native:
            to_max = lambda v: v                            # bf16 max is exact (v6e/v7x)
        else:
            to_max = lambda v: v.astype(jnp.float32)        # v5e: no bf16 VPU

        if n_chunks <= _CHUNK_UNROLL_THRESHOLD:
            # ---- pass 1: running max (native dtype, no per-chunk cast) ----
            m128 = to_max(load_chunk(0, False))
            for k in range(1, n_chunks):
                m128 = jnp.maximum(m128, to_max(load_chunk(k, False)))
            row_max = jnp.max(m128.astype(jnp.float32), axis=-1, keepdims=True)  # [TB,1]

            # ---- pass 2: exp-sum + one-hot target gather (single f32 cast/element) ----
            s128 = jnp.zeros((tb, _LANES), jnp.float32)
            g128 = jnp.zeros((tb, _LANES), jnp.float32)
            for k in range(n_chunks):
                xk = load_chunk(k, False).astype(jnp.float32)
                s128 = s128 + jnp.exp(xk - row_max)
                hit = lane == (tgt - k * _LANES)            # shift done on the [TB,1] side
                g128 = jnp.where(hit, xk, g128)             # disjoint hits -> select only
        else:
            # Large class counts: rolled loops with modest unroll (bounded code size).
            def max_body(k, m):
                return jnp.maximum(m, to_max(load_chunk(k, True)))

            m128 = lax.fori_loop(1, n_chunks, max_body,
                                 to_max(load_chunk(0, False)), unroll=8)
            row_max = jnp.max(m128.astype(jnp.float32), axis=-1, keepdims=True)

            def exp_body(k, carry):
                s, g = carry
                xk = load_chunk(k, True).astype(jnp.float32)
                s = s + jnp.exp(xk - row_max)
                hit = lane == (tgt - k * _LANES)
                g = jnp.where(hit, xk, g)
                return s, g

            s128, g128 = lax.fori_loop(
                0, n_chunks, exp_body,
                (jnp.zeros((tb, _LANES), jnp.float32),
                 jnp.zeros((tb, _LANES), jnp.float32)),
                unroll=8)

        sum_exp = jnp.sum(s128, axis=-1, keepdims=True)     # [TB, 1]
        tgt_logit = jnp.sum(g128, axis=-1, keepdims=True)   # [TB, 1]
    else:
        # Small / non-128-multiple class count: plain full-width reductions.
        xf = logits_ref[...].astype(jnp.float32)
        row_max = jnp.max(xf, axis=-1, keepdims=True)
        sum_exp = jnp.sum(jnp.exp(xf - row_max), axis=-1, keepdims=True)
        col = jax.lax.broadcasted_iota(jnp.int32, (tb, c), 1)
        tgt_logit = jnp.sum(jnp.where(col == tgt, xf, 0.0), axis=-1, keepdims=True)

    lse = jnp.log(sum_exp) + row_max
    per_example = lse - tgt_logit                           # [TB, 1]

    # Mask batch-padding rows of the last (partial) tile.  MUST stay a select so that
    # garbage/NaN rows from the out-of-bounds boundary block never contribute.
    row = jax.lax.broadcasted_iota(jnp.int32, (tb, 1), 0) + i * tile_rows
    per_example = jnp.where(row < n_valid, per_example, 0.0)

    partial = jnp.sum(per_example)
    # Lane-dense, unmasked per-tile output block; JAX finishes the sum / mean.
    out_ref[...] = jnp.zeros((1, 8, _LANES), jnp.float32) + partial


def _tpu_generation():
    try:
        kind = jax.devices()[0].device_kind
        m = re.search(r"(\d+)", kind)
        if m:
            return int(m.group(1))
    except Exception:
        pass
    return 7  # unknown -> assume newest (conservative VMEM, bf16 VALU available)


def _vmem_capacity_bytes(gen):
    try:
        info = pltpu.get_tpu_info()
        cap = int(getattr(info, "vmem_capacity_bytes", 0) or 0)
        if cap > 0:
            return cap
    except Exception:
        pass
    # v5e / v6e: 128 MiB per TensorCore; v7x: 64 MiB per TensorCore.
    return (128 if gen <= 6 else 64) * 1024 * 1024


def _choose_tile_rows(b, c, itemsize, align, vmem_cap):
    """Pick the logits tile: big on 128-MiB chips, tighter on v7x, >=2 tiles when possible."""
    big_vmem = vmem_cap >= 100 * 1024 * 1024
    target_bytes = (8 if big_vmem else 6) * 1024 * 1024     # per double-buffered buffer
    rows = max(1, target_bytes // max(1, c * itemsize))
    rows = max(align, (rows // align) * align)
    rows = min(rows, 4096)
    # Keep the grid >= 2 tiles when the batch allows it (both v7x TensorCores get work).
    if b >= 2 * align:
        half = -(-((b + 1) // 2) // align) * align
        rows = min(rows, max(align, half))
    b_rounded = -(-b // align) * align
    return min(rows, max(align, b_rounded))


def cross_entropy_loss(logits, target, *, tile_rows=None):
    """criterion(logits, target) -> scalar mean cross-entropy (Pallas kernel)."""
    b, c = logits.shape
    itemsize = jnp.dtype(logits.dtype).itemsize
    align = 16 if itemsize == 2 else 8

    gen = _tpu_generation()
    vmem_cap = _vmem_capacity_bytes(gen)
    if tile_rows is None:
        tile_rows = _choose_tile_rows(b, c, itemsize, align, vmem_cap)
    num_tiles = pl.cdiv(b, tile_rows)

    big_vmem = vmem_cap >= 100 * 1024 * 1024
    vmem_limit = (64 if big_vmem else 32) * 1024 * 1024

    target2d = target.reshape(b, 1).astype(jnp.int32)

    kernel = functools.partial(
        _cross_entropy_tile_kernel,
        n_valid=b,
        tile_rows=tile_rows,
        max_in_native=(gen >= 6),      # v5e has no bf16 VPU -> f32 max pass there
    )

    partials = pl.pallas_call(
        kernel,
        out_shape=jax.ShapeDtypeStruct((num_tiles, 8, _LANES), jnp.float32),
        grid=(num_tiles,),
        in_specs=[
            # Logits stay in their native dtype (bf16 never upcast before the HBM read).
            # If a profile shows exposed DMA (small C / short compute), add
            # pipeline_mode=pl.Buffered(3) here; default depth-2 is kept otherwise.
            pl.BlockSpec((tile_rows, c), lambda i: (i, 0)),
            # Targets as a small [TB, 1] int32 VMEM block advancing with the batch axis.
            pl.BlockSpec((tile_rows, 1), lambda i: (i, 0)),
        ],
        out_specs=pl.BlockSpec((1, 8, _LANES), lambda i: (i, 0, 0)),
        compiler_params=pltpu.CompilerParams(
            dimension_semantics=("parallel",),               # batch tiles shard across TCs
            vmem_limit_bytes=vmem_limit,
        ),
    )(logits, target2d)

    return jnp.sum(partials[:, 0, 0]) / b


class LossOperation:
    """JAX mirror of the PyTorch LossOperation: writes batch['loss']."""

    def __init__(self, criterion):
        self.criterion = criterion

    def __call__(self, batch):
        batch["loss"] = self.criterion(batch["logits"], batch["target"])
        return batch


if __name__ == "__main__":
    key = jax.random.PRNGKey(0)
    k1, k2, k3, k4, k5, k6, k7, k8 = jax.random.split(key, 8)

    op = LossOperation(cross_entropy_loss)

    def reference(logits, target):
        lf = logits.astype(jnp.float32)
        return jnp.mean(
            jax.nn.logsumexp(lf, axis=-1)
            - jnp.take_along_axis(lf, target[:, None], axis=-1)[:, 0]
        )

    # Case 1: small f32 batch (single tile, narrow class axis).
    B, C = 8, 32
    logits = jax.random.normal(k1, (B, C), dtype=jnp.float32)
    target = jax.random.randint(k2, (B,), 0, C, dtype=jnp.int32)
    batch = op({"logits": logits, "target": target})
    loss = jax.block_until_ready(batch["loss"])
    ref = reference(logits, target)
    assert jnp.allclose(loss, ref, atol=1e-5, rtol=1e-5), (loss, ref)

    # Case 2: multi-tile grid (parallel batch axis), bf16 logits, chunked class reduce.
    B, C, TB = 48, 256, 16
    logits = jax.random.normal(k3, (B, C), dtype=jnp.float32).astype(jnp.bfloat16)
    target = jax.random.randint(k4, (B,), 0, C, dtype=jnp.int32)
    loss = jax.block_until_ready(cross_entropy_loss(logits, target, tile_rows=TB))
    ref = reference(logits, target)
    assert jnp.allclose(loss, ref, atol=1e-4, rtol=1e-4), (loss, ref)

    # Case 3: batch not divisible by the tile -> padded boundary rows masked in-kernel.
    B, C, TB = 20, 384, 8
    logits = jax.random.normal(k5, (B, C), dtype=jnp.float32)
    target = jax.random.randint(k6, (B,), 0, C, dtype=jnp.int32)
    loss = jax.block_until_ready(cross_entropy_loss(logits, target, tile_rows=TB))
    ref = reference(logits, target)
    assert jnp.allclose(loss, ref, atol=1e-5, rtol=1e-5), (loss, ref)

    # Case 4: large class count (> 32 chunks) -> rolled fori_loop path + auto tile sizing.
    B, C = 16, 40 * _LANES
    logits = jax.random.normal(k7, (B, C), dtype=jnp.float32)
    target = jax.random.randint(k8, (B,), 0, C, dtype=jnp.int32)
    loss = jax.block_until_ready(cross_entropy_loss(logits, target))
    ref = reference(logits, target)
    assert jnp.allclose(loss, ref, atol=1e-5, rtol=1e-5), (loss, ref)

    print("KERNEL_OK")
</pallas_src>

<mosaic_0001>
module attributes {stable_mosaic.version = 11 : i64} {
  func.func @_cross_entropy_tile_kernel(%arg0: i32, %arg1: memref<8x32xf32, #tpu.memory_space<vmem>>, %arg2: memref<8x1xi32, #tpu.memory_space<vmem>>, %arg3: memref<1x8x128xf32, #tpu.memory_space<vmem>>) attributes {dimension_semantics = [#tpu.dimension_semantics<parallel>], iteration_bounds = array<i64: 1>, scalar_prefetch = 0 : i64, scratch_operands = 0 : i64, tpu.core_type = #tpu.core_type<tc>, window_params = [{transform_indices = @transform_0, window_bounds = array<i64: 8, 32>}, {transform_indices = @transform_1, window_bounds = array<i64: 8, 1>}, {transform_indices = @transform_2, window_bounds = array<i64: 1, 8, 128>}]} {
    %c0 = arith.constant 0 : index
    %c0_0 = arith.constant 0 : index
    %0 = vector.load %arg2[%c0, %c0_0] : memref<8x1xi32, #tpu.memory_space<vmem>>, vector<8x1xi32>
    %c0_1 = arith.constant 0 : index
    %c0_2 = arith.constant 0 : index
    %1 = vector.load %arg1[%c0_1, %c0_2] : memref<8x32xf32, #tpu.memory_space<vmem>>, vector<8x32xf32>
    %cst = arith.constant dense<0xFF800000> : vector<8xf32>
    %2 = vector.multi_reduction <maximumf>, %1, %cst [1] : vector<8x32xf32> to vector<8xf32>
    %3 = vector.shape_cast %2 : vector<8xf32> to vector<8x1xf32>
    %4 = vector.broadcast %3 : vector<8x1xf32> to vector<8x32xf32>
    %5 = arith.subf %1, %4 : vector<8x32xf32>
    %6 = math.exp %5 : vector<8x32xf32>
    %cst_3 = arith.constant dense<0.000000e+00> : vector<8xf32>
    %7 = vector.multi_reduction <add>, %6, %cst_3 [1] : vector<8x32xf32> to vector<8xf32>
    %8 = vector.shape_cast %7 : vector<8xf32> to vector<8x1xf32>
    %9 = tpu.iota {dimensions = array<i32: 1>} : vector<8x32xi32>
    %10 = vector.broadcast %0 : vector<8x1xi32> to vector<8x32xi32>
    %11 = arith.cmpi eq, %9, %10 : vector<8x32xi32>
    %cst_4 = arith.constant 0.000000e+00 : f32
    %12 = vector.broadcast %cst_4 : f32 to vector<8x32xf32>
    %13 = arith.select %11, %1, %12 : vector<8x32xi1>, vector<8x32xf32>
    %cst_5 = arith.constant dense<0.000000e+00> : vector<8xf32>
    %14 = vector.multi_reduction <add>, %13, %cst_5 [1] : vector<8x32xf32> to vector<8xf32>
    %15 = vector.shape_cast %14 : vector<8xf32> to vector<8x1xf32>
    %16 = math.log %8 : vector<8x1xf32>
    %17 = arith.addf %16, %3 : vector<8x1xf32>
    %18 = arith.subf %17, %15 : vector<8x1xf32>
    %19 = tpu.iota {dimensions = array<i32: 0>} : vector<8x1xi32>
    %c8_i32 = arith.constant 8 : i32
    %20 = arith.muli %arg0, %c8_i32 : i32
    %21 = vector.broadcast %20 : i32 to vector<8x1xi32>
    %22 = arith.addi %19, %21 : vector<8x1xi32>
    %c8_i32_6 = arith.constant 8 : i32
    %23 = vector.broadcast %c8_i32_6 : i32 to vector<8x1xi32>
    %24 = arith.cmpi slt, %22, %23 : vector<8x1xi32>
    %cst_7 = arith.constant 0.000000e+00 : f32
    %25 = vector.broadcast %cst_7 : f32 to vector<8x1xf32>
    %26 = arith.select %24, %18, %25 : vector<8x1xi1>, vector<8x1xf32>
    %27 = vector.shape_cast %26 : vector<8x1xf32> to vector<1x8x1xf32>
    %cst_8 = arith.constant dense<0.000000e+00> : vector<1xf32>
    %28 = vector.multi_reduction <add>, %27, %cst_8 [1, 2] : vector<1x8x1xf32> to vector<1xf32>
    %29 = vector.shape_cast %28 : vector<1xf32> to vector<1x1x1xf32>
    %30 = vector.extract %29[0, 0, 0] : f32 from vector<1x1x1xf32>
    %cst_9 = arith.constant 0.000000e+00 : f32
    %31 = vector.broadcast %cst_9 : f32 to vector<1x8x128xf32>
    %32 = vector.broadcast %30 : f32 to vector<1x8x128xf32>
    %33 = arith.addf %31, %32 : vector<1x8x128xf32>
    %c0_10 = arith.constant 0 : index
    %c0_11 = arith.constant 0 : index
    %c0_12 = arith.constant 0 : index
    %34 = vector.load %arg3[%c0_10, %c0_11, %c0_12] : memref<1x8x128xf32, #tpu.memory_space<vmem>>, vector<1x8x128xf32>
    tpu.vector_store %arg3[%c0_10, %c0_11, %c0_12], %33 {strides = array<i32>} : memref<1x8x128xf32, #tpu.memory_space<vmem>>, vector<1x8x128xf32>,
    return
  }
  func.func @transform_0(%arg0: i32) -> (i32, i32) {
    %c0_i32 = arith.constant 0 : i32
    %c0_i32_0 = arith.constant 0 : i32
    return %arg0, %c0_i32 : i32, i32
  }
  func.func @transform_1(%arg0: i32) -> (i32, i32) {
    %c0_i32 = arith.constant 0 : i32
    %c0_i32_0 = arith.constant 0 : i32
    return %arg0, %c0_i32 : i32, i32
  }
  func.func @transform_2(%arg0: i32) -> (i32, i32, i32) {
    %c0_i32 = arith.constant 0 : i32
    %c0_i32_0 = arith.constant 0 : i32
    %c0_i32_1 = arith.constant 0 : i32
    return %arg0, %c0_i32, %c0_i32_0 : i32, i32, i32
  }
}

</mosaic_0001>

<bundles_post_ra>
// kernel: tpu_custom_call.1
= control target key start
LH: loop header
LB: loop body
LE: loop exit
PB: predicated region body
PF: predicated region fallthrough
CT: control target
= control target key end

     0   :  { %vm14_vm0 = vcmask 261120   ;;  %s133_s0 = inlined_call_operand.vmem [shape: f32[8,32], index: 0, kind: input, shape index: {}]   ;;  %s134_s1 = inlined_call_operand.vmem [shape: s32[8,1], index: 1, kind: input, shape index: {}]   ;;  %s135_s2 = inlined_call_operand.hbm [shape: f32[1,8,128], index: 2, kind: output, shape index: {}]  }
   0x1   :  { %v13_v0 = vld [vmem:[%s133_s0] sm:$0xff] }
   0x2   :  { %7 = vsyncpa [#allocation3], 0  ;;  %v15_v1 = vsel %vm14_vm0, %v13_v0, -inf  ;;  %v104_v2 = vmov 0   ;;  %v12_v3 = vld [vmem:[%s134_s1] sm:$0xff]  ;;  %v24_v7 = vlaneseq  ;;  %vm45_vm2 = vcmask 7168  }
   0x3   :  { %77 = vset.pattern.permute.xlu0 %v104_v2  ;;  %s105_s0 = smov [#allocation2]  }
   0x4   :  { %16 = vmax.xlane.f32.xlu0 %v15_v1  ;;  %v25_v8 = vand.u32 127, %v24_v7  ;;  %s65_s1 = sshll.u32 %s105_s0, 4  ;;  %s66_s1 = int_to_ptr.vmem [resolvable:$true] %s65_s1 }
   0x5   :  { %s82_s14 = scalar_lea.vmem %s66_s1, 128  ;;  %p87_p1 = scmp.lt.s32.totalorder %s66_s1, %s66_s1 }
   0x6   :  { %p83_p0 = scmp.ne.s32.totalorder %s66_s1, %s82_s14  ;;  %p88_p2 = scmp.lt.s32.totalorder %s82_s14, %s82_s14 }
   0x8   :  { %p89_p3 = por %p88_p2, %p87_p1 }
   0xa   :  { %p90_p4 = pnand %p89_p3, %p83_p0 }
  0x1a   :  { %27 = vperm.xlu0 %77, %v12_v3  }
  0x8d   :  { %v17_v4 = vpop.xlane.xlu0 %16 }
  0x8e   :  { %v18_v5 = vsub.f32 %v13_v0, %v17_v4 }
  0x90   :  { %v19_v6 = vmul.f32 1.442695, %v18_v5 }
  0x92   :  { %78 = vpow2.f32 %v19_v6 }
  0x95   :  { %v28_v9 = vpop.permute.xlu0 %27 }
  0x96   :  { %vm29_vm1 = vcmp.eq.s32.totalorder %v25_v8, %v28_v9 }
  0x97   :  { %v30_v11 = vsel %vm29_vm1, %v13_v0, 0.0 }
  0x98   :  { %v31_v13 = vsel %vm14_vm0, %v30_v11, 0.0 }
  0x9f   :  { %v79_v10 = vpop.eup %78 }
  0xa0   :  { %v21_v12 = vsel %vm14_vm0, %v79_v10, 0.0 }
  0xa1   :  { %22 = vadd.xlane.f32.xlu1 %v21_v12 }
  0xa5   :  { %32 = vadd.xlane.f32.xlu1 %v31_v13 }
 0x12a   :  { %v23_v14 = vpop.xlane.xlu1 %22 }
 0x12b   :  { %80 = vlog2.f32 %v23_v14 }
 0x12e   :  { %v33_v17 = vpop.xlane.xlu1 %32 }
 0x138   :  { %v81_v15 = vpop.eup %80 }
 0x139   :  { %v35_v16 = vmul.f32 0.6931472, %v81_v15 }
 0x13b   :  { %v36_v18 = vadd.f32 %v35_v16, %v17_v4 }
 0x13d   :  { %v37_v19 = vsub.f32 %v36_v18, %v33_v17 }
 0x13f   :  { %v46_v20 = vsel %vm45_vm2, %v37_v19, 0.0 }
 0x140   :  { %47 = vadd.xlane.f32.xlu1 %v46_v20 }
 0x1c9   :  { %v48_v21 = vpop.xlane.xlu1 %47 }
 0x1ca   :  { %v49_v22 = vrot.slane %v48_v21, 4 }
 0x1cc   :  { %v50_v23 = vadd.f32 %v49_v22, %v48_v21 }
 0x1ce   :  { %v51_v24 = vrot.slane %v50_v23, 2 }
 0x1d0   :  { %v52_v25 = vadd.f32 %v51_v24, %v50_v23 }
 0x1d2   :  { %v53_v26 = vrot.slane %v52_v25, 1 }
 0x1d4   :  { %v54_v27 = vadd.f32 %v53_v26, %v52_v25 }
 0x1d6   :  { %73 = vpush %v54_v27 }
 0x207   :  { %s74_s13 = spop %73 }
 0x208   :  { %v56_v28 = vstv %s74_s13 }
 0x209   :  { %58 = vst [vmem:[#allocation2] sm:$0xff] %v56_v28 }
 0x20a   :  { %93 = shalt.err (!%p90_p4)
}
 0x20b   :  { %68 = dma.vmem_to_hbm [thread:$0]  %s66_s1, 128, %s135_s2, [#allocation3]  }
 0x20c   :  { %102 = dma.done.wait [#allocation3], 128  }
 0x20d   :  { %103 = vsyncadd [#allocation3], 4294967168 }
 0x20e   :  { %72 = vsyncpa [#allocation3], 1 }

</bundles_post_ra>
